<compile_context>
chip_gen: v7x
topology: tpu7x:2x2x1
jax: 0.10.0
libtpu: 0.0.40
codegen_flags: <defaults>
</compile_context>

<pallas_src>
import functools

import jax
import jax.numpy as jnp
from jax.experimental import pallas as pl
from jax.experimental.pallas import tpu as pltpu


def _round_up(x, m):
    return (x + m - 1) // m * m


def _matmul_kernel(a_ref, b_ref, o_ref, acc_ref, *, apply_relu):
    """Tiled matmul with f32 accumulation and optional fused ReLU epilogue.

    a_ref   : (tm, tk) tile of A
    b_ref   : (tk, tn) tile of B
    o_ref   : (tm, tn) tile of the output (written on the last K step)
    acc_ref : (tm, tn) f32 VMEM accumulator (persists across the K axis)
    """
    @pl.when(pl.program_id(2) == 0)
    def _():
        acc_ref[...] = jnp.zeros_like(acc_ref)

    acc_ref[...] += jnp.dot(a_ref[...], b_ref[...],
                            preferred_element_type=jnp.float32)

    @pl.when(pl.program_id(2) == pl.num_programs(2) - 1)
    def _():
        r = acc_ref[...]
        if apply_relu:
            r = jnp.maximum(r, 0.0)
        o_ref[...] = r.astype(o_ref.dtype)


def _tiled_matmul(a, b, *, tm, tn, tk, apply_relu, out_dtype=jnp.float32):
    """C = A @ B (optionally relu'd), with A (M,K), B (K,N) already tile-aligned."""
    m, k = a.shape
    k2, n = b.shape
    assert k == k2 and m % tm == 0 and n % tn == 0 and k % tk == 0

    grid = (m // tm, n // tn, k // tk)

    # Double-buffered A/B tiles + double-buffered out tile + f32 accumulator,
    # with 2x headroom; never exceed v7x physical VMEM (64 MiB).
    tile_bytes = 4 * (2 * tm * tk + 2 * tk * tn + 3 * tm * tn)
    vmem_limit = int(min(max(2 * tile_bytes, 8 << 20), 64 << 20))

    kernel = functools.partial(_matmul_kernel, apply_relu=apply_relu)

    return pl.pallas_call(
        kernel,
        out_shape=jax.ShapeDtypeStruct((m, n), out_dtype),
        grid_spec=pltpu.PrefetchScalarGridSpec(
            num_scalar_prefetch=0,
            grid=grid,
            in_specs=[
                pl.BlockSpec((tm, tk), lambda i, j, kk: (i, kk)),
                pl.BlockSpec((tk, tn), lambda i, j, kk: (kk, j)),
            ],
            out_specs=pl.BlockSpec((tm, tn), lambda i, j, kk: (i, j)),
            scratch_shapes=[pltpu.VMEM((tm, tn), jnp.float32)],
        ),
        compiler_params=pltpu.CompilerParams(
            # Row/col axes are independent -> parallel (megacore sharding on
            # v7x); the K reduction carries the accumulator -> arbitrary.
            dimension_semantics=("parallel", "parallel", "arbitrary"),
            vmem_limit_bytes=vmem_limit,
        ),
    )(a, b)


@functools.partial(
    jax.jit, static_argnames=("active", "row_block", "col_block", "k_block"))
def gnn_layer(features, adj, weight, active=True,
              row_block=512, col_block=256, k_block=512):
    """Pallas implementation of GNNLayer.forward.

    features : (N, Fin) float32
    adj      : (N, N)   float32
    weight   : (Fin, Fout) float32
    returns  : (N, Fout) float32, relu-activated if `active`
    """
    n, fin = features.shape
    fin_w, fout = weight.shape
    assert fin == fin_w
    assert adj.shape == (n, n)

    # MXU-aligned tile sizes, clamped to the (128-padded) problem dims.
    bn = min(row_block, _round_up(n, 128))     # row tile AND adj K tile
    tn = min(col_block, _round_up(fout, 128))  # lane-dense output columns
    tkf = min(k_block, _round_up(fin, 128))    # K tile of features @ weight

    n_pad = _round_up(n, bn)
    fout_pad = _round_up(fout, tn)
    fin_pad = _round_up(fin, tkf)

    f = jnp.pad(features.astype(jnp.float32),
                ((0, n_pad - n), (0, fin_pad - fin)))
    w = jnp.pad(weight.astype(jnp.float32),
                ((0, fin_pad - fin), (0, fout_pad - fout)))
    a = jnp.pad(adj.astype(jnp.float32),
                ((0, n_pad - n), (0, n_pad - n)))

    # Stage 1: support = features @ weight  (no activation).
    support = _tiled_matmul(f, w, tm=bn, tn=tn, tk=tkf, apply_relu=False)

    # Stage 2: output = relu(adj @ support); row axis parallel across cores.
    out = _tiled_matmul(a, support, tm=bn, tn=tn, tk=bn, apply_relu=active)

    return out[:n, :fout]


if __name__ == "__main__":
    key = jax.random.PRNGKey(0)
    k_feat, k_adj, k_w = jax.random.split(key, 3)

    N, FIN, FOUT = 16, 8, 32  # small graph: 16 nodes, 8 -> 32 features

    features = jax.random.normal(k_feat, (N, FIN), dtype=jnp.float32)
    # Simple symmetric, row-normalized adjacency with self loops.
    a = (jax.random.uniform(k_adj, (N, N)) > 0.7).astype(jnp.float32)
    a = jnp.maximum(a, a.T) + jnp.eye(N, dtype=jnp.float32)
    adj = a / jnp.sum(a, axis=1, keepdims=True)

    # Xavier-uniform weight init (matches torch.nn.init.xavier_uniform_).
    bound = float(jnp.sqrt(6.0 / (FIN + FOUT)))
    weight = jax.random.uniform(k_w, (FIN, FOUT), jnp.float32,
                                minval=-bound, maxval=bound)

    out = gnn_layer(features, adj, weight, active=True)
    out = jax.block_until_ready(out)

    # Reference check in plain JAX.
    ref = jnp.maximum(adj @ (features @ weight), 0.0)
    assert out.shape == (N, FOUT)
    assert jnp.allclose(out, ref, atol=1e-5, rtol=1e-5)

    print("KERNEL_OK")
</pallas_src>

<mosaic_0001>
module attributes {stable_mosaic.version = 11 : i64} {
  func.func @_matmul_kernel(%arg0: i32, %arg1: i32, %arg2: i32, %arg3: memref<128x128xf32, #tpu.memory_space<vmem>>, %arg4: memref<128x128xf32, #tpu.memory_space<vmem>>, %arg5: memref<128x128xf32, #tpu.memory_space<vmem>>, %arg6: memref<128x128xf32, #tpu.memory_space<vmem>>) attributes {dimension_semantics = [#tpu.dimension_semantics<parallel>, #tpu.dimension_semantics<parallel>, #tpu.dimension_semantics<arbitrary>], iteration_bounds = array<i64: 1, 1, 1>, scalar_prefetch = 0 : i64, scratch_operands = 1 : i64, tpu.core_type = #tpu.core_type<tc>, window_params = [{transform_indices = @transform_0, window_bounds = array<i64: 128, 128>}, {transform_indices = @transform_1, window_bounds = array<i64: 128, 128>}, {transform_indices = @transform_2, window_bounds = array<i64: 128, 128>}]} {
    %c0_i32 = arith.constant 0 : i32
    %0 = arith.cmpi eq, %arg2, %c0_i32 : i32
    %1 = arith.extui %0 : i1 to i32
    %c0_i32_0 = arith.constant 0 : i32
    %2 = arith.cmpi ne, %1, %c0_i32_0 : i32
    scf.if %2 {
      %cst_10 = arith.constant 0.000000e+00 : f32
      %12 = vector.broadcast %cst_10 : f32 to vector<128x128xf32>
      %c0_11 = arith.constant 0 : index
      %c0_12 = arith.constant 0 : index
      %13 = vector.load %arg6[%c0_11, %c0_12] : memref<128x128xf32, #tpu.memory_space<vmem>>, vector<128x128xf32>
      tpu.vector_store %arg6[%c0_11, %c0_12], %12 {strides = array<i32>} : memref<128x128xf32, #tpu.memory_space<vmem>>, vector<128x128xf32>,
    } else {
    }
    %c0 = arith.constant 0 : index
    %c0_1 = arith.constant 0 : index
    %3 = vector.load %arg6[%c0, %c0_1] : memref<128x128xf32, #tpu.memory_space<vmem>>, vector<128x128xf32>
    %c0_2 = arith.constant 0 : index
    %c0_3 = arith.constant 0 : index
    %4 = vector.load %arg3[%c0_2, %c0_3] : memref<128x128xf32, #tpu.memory_space<vmem>>, vector<128x128xf32>
    %c0_4 = arith.constant 0 : index
    %c0_5 = arith.constant 0 : index
    %5 = vector.load %arg4[%c0_4, %c0_5] : memref<128x128xf32, #tpu.memory_space<vmem>>, vector<128x128xf32>
    %cst = arith.constant dense<0.000000e+00> : vector<128x128xf32>
    %6 = tpu.matmul %4, %5, %cst {dimension_numbers = #tpu.dot_dimension_numbers<[1], [0], [0], [1], [0, 0, 1, 1], [], []>} : vector<128x128xf32>, vector<128x128xf32>, vector<128x128xf32> -> vector<128x128xf32>
    %7 = arith.addf %3, %6 : vector<128x128xf32>
    %c0_6 = arith.constant 0 : index
    %c0_7 = arith.constant 0 : index
    %8 = vector.load %arg6[%c0_6, %c0_7] : memref<128x128xf32, #tpu.memory_space<vmem>>, vector<128x128xf32>
    tpu.vector_store %arg6[%c0_6, %c0_7], %7 {strides = array<i32>} : memref<128x128xf32, #tpu.memory_space<vmem>>, vector<128x128xf32>,
    %c0_i32_8 = arith.constant 0 : i32
    %9 = arith.cmpi eq, %arg2, %c0_i32_8 : i32
    %10 = arith.extui %9 : i1 to i32
    %c0_i32_9 = arith.constant 0 : i32
    %11 = arith.cmpi ne, %10, %c0_i32_9 : i32
    scf.if %11 {
      %c0_10 = arith.constant 0 : index
      %c0_11 = arith.constant 0 : index
      %12 = vector.load %arg6[%c0_10, %c0_11] : memref<128x128xf32, #tpu.memory_space<vmem>>, vector<128x128xf32>
      %c0_12 = arith.constant 0 : index
      %c0_13 = arith.constant 0 : index
      %13 = vector.load %arg5[%c0_12, %c0_13] : memref<128x128xf32, #tpu.memory_space<vmem>>, vector<128x128xf32>
      tpu.vector_store %arg5[%c0_12, %c0_13], %12 {strides = array<i32>} : memref<128x128xf32, #tpu.memory_space<vmem>>, vector<128x128xf32>,
    } else {
    }
    return
  }
  func.func @transform_0(%arg0: i32, %arg1: i32, %arg2: i32) -> (i32, i32) {
    %c0_i32 = arith.constant 0 : i32
    return %arg0, %arg2 : i32, i32
  }
  func.func @transform_1(%arg0: i32, %arg1: i32, %arg2: i32) -> (i32, i32) {
    %c0_i32 = arith.constant 0 : i32
    return %arg2, %arg1 : i32, i32
  }
  func.func @transform_2(%arg0: i32, %arg1: i32, %arg2: i32) -> (i32, i32) {
    %c0_i32 = arith.constant 0 : i32
    return %arg0, %arg1 : i32, i32
  }
}

module attributes {stable_mosaic.version = 11 : i64} {
  func.func @_matmul_kernel(%arg0: i32, %arg1: i32, %arg2: i32, %arg3: memref<128x128xf32, #tpu.memory_space<vmem>>, %arg4: memref<128x128xf32, #tpu.memory_space<vmem>>, %arg5: memref<128x128xf32, #tpu.memory_space<vmem>>, %arg6: memref<128x128xf32, #tpu.memory_space<vmem>>) attributes {dimension_semantics = [#tpu.dimension_semantics<parallel>, #tpu.dimension_semantics<parallel>, #tpu.dimension_semantics<arbitrary>], iteration_bounds = array<i64: 1, 1, 1>, scalar_prefetch = 0 : i64, scratch_operands = 1 : i64, tpu.core_type = #tpu.core_type<tc>, window_params = [{transform_indices = @transform_0, window_bounds = array<i64: 128, 128>}, {transform_indices = @transform_1, window_bounds = array<i64: 128, 128>}, {transform_indices = @transform_2, window_bounds = array<i64: 128, 128>}]} {
    %c0_i32 = arith.constant 0 : i32
    %0 = arith.cmpi eq, %arg2, %c0_i32 : i32
    %1 = arith.extui %0 : i1 to i32
    %c0_i32_0 = arith.constant 0 : i32
    %2 = arith.cmpi ne, %1, %c0_i32_0 : i32
    scf.if %2 {
      %cst_10 = arith.constant 0.000000e+00 : f32
      %12 = vector.broadcast %cst_10 : f32 to vector<128x128xf32>
      %c0_11 = arith.constant 0 : index
      %c0_12 = arith.constant 0 : index
      %13 = vector.load %arg6[%c0_11, %c0_12] : memref<128x128xf32, #tpu.memory_space<vmem>>, vector<128x128xf32>
      tpu.vector_store %arg6[%c0_11, %c0_12], %12 {strides = array<i32>} : memref<128x128xf32, #tpu.memory_space<vmem>>, vector<128x128xf32>,
    } else {
    }
    %c0 = arith.constant 0 : index
    %c0_1 = arith.constant 0 : index
    %3 = vector.load %arg6[%c0, %c0_1] : memref<128x128xf32, #tpu.memory_space<vmem>>, vector<128x128xf32>
    %c0_2 = arith.constant 0 : index
    %c0_3 = arith.constant 0 : index
    %4 = vector.load %arg3[%c0_2, %c0_3] : memref<128x128xf32, #tpu.memory_space<vmem>>, vector<128x128xf32>
    %c0_4 = arith.constant 0 : index
    %c0_5 = arith.constant 0 : index
    %5 = vector.load %arg4[%c0_4, %c0_5] : memref<128x128xf32, #tpu.memory_space<vmem>>, vector<128x128xf32>
    %cst = arith.constant dense<0.000000e+00> : vector<128x128xf32>
    %6 = tpu.matmul %4, %5, %cst {dimension_numbers = #tpu.dot_dimension_numbers<[1], [0], [0], [1], [0, 0, 1, 1], [], []>} : vector<128x128xf32>, vector<128x128xf32>, vector<128x128xf32> -> vector<128x128xf32>
    %7 = arith.addf %3, %6 : vector<128x128xf32>
    %c0_6 = arith.constant 0 : index
    %c0_7 = arith.constant 0 : index
    %8 = vector.load %arg6[%c0_6, %c0_7] : memref<128x128xf32, #tpu.memory_space<vmem>>, vector<128x128xf32>
    tpu.vector_store %arg6[%c0_6, %c0_7], %7 {strides = array<i32>} : memref<128x128xf32, #tpu.memory_space<vmem>>, vector<128x128xf32>,
    %c0_i32_8 = arith.constant 0 : i32
    %9 = arith.cmpi eq, %arg2, %c0_i32_8 : i32
    %10 = arith.extui %9 : i1 to i32
    %c0_i32_9 = arith.constant 0 : i32
    %11 = arith.cmpi ne, %10, %c0_i32_9 : i32
    scf.if %11 {
      %c0_10 = arith.constant 0 : index
      %c0_11 = arith.constant 0 : index
      %12 = vector.load %arg6[%c0_10, %c0_11] : memref<128x128xf32, #tpu.memory_space<vmem>>, vector<128x128xf32>
      %cst_12 = arith.constant 0.000000e+00 : f32
      %13 = vector.broadcast %cst_12 : f32 to vector<128x128xf32>
      %14 = arith.maximumf %12, %13 : vector<128x128xf32>
      %c0_13 = arith.constant 0 : index
      %c0_14 = arith.constant 0 : index
      %15 = vector.load %arg5[%c0_13, %c0_14] : memref<128x128xf32, #tpu.memory_space<vmem>>, vector<128x128xf32>
      tpu.vector_store %arg5[%c0_13, %c0_14], %14 {strides = array<i32>} : memref<128x128xf32, #tpu.memory_space<vmem>>, vector<128x128xf32>,
    } else {
    }
    return
  }
  func.func @transform_0(%arg0: i32, %arg1: i32, %arg2: i32) -> (i32, i32) {
    %c0_i32 = arith.constant 0 : i32
    return %arg0, %arg2 : i32, i32
  }
  func.func @transform_1(%arg0: i32, %arg1: i32, %arg2: i32) -> (i32, i32) {
    %c0_i32 = arith.constant 0 : i32
    return %arg2, %arg1 : i32, i32
  }
  func.func @transform_2(%arg0: i32, %arg1: i32, %arg2: i32) -> (i32, i32) {
    %c0_i32 = arith.constant 0 : i32
    return %arg0, %arg1 : i32, i32
  }
}

</mosaic_0001>

<bundles_post_ra>
// kernel: gnn_layer.2
= control target key start
LH: loop header
LB: loop body
LE: loop exit
PB: predicated region body
PF: predicated region fallthrough
CT: control target
= control target key end

     0   :  { %s590_s1 = inlined_call_operand.vmem [shape: f32[128,128], index: 1, kind: input, shape index: {}]   ;;  %s591_s0 = inlined_call_operand.vmem [shape: f32[128,128], index: 0, kind: input, shape index: {}]   ;;  %s592_s2 = inlined_call_operand.vmem [shape: f32[128,128], index: 2, kind: output, shape index: {}]  }
   0x1   :  { %v63_v0 = vld [vmem:[%s590_s1] sm:$0xff]  ;;  %v64_v1 = vld [vmem:[%s590_s1 + $0x8] sm:$0xff]  ;;  %v65_v2 = vld [vmem:[%s590_s1 + $0x10] sm:$0xff] }
   0x2   :  { %v383_v3 = vpack.c.bf16 %v64_v1, %v63_v0  ;;  %v66_v4 = vld [vmem:[%s590_s1 + $0x18] sm:$0xff]  ;;  %v67_v6 = vld [vmem:[%s590_s1 + $0x20] sm:$0xff]  ;;  %v68_v7 = vld [vmem:[%s590_s1 + $0x28] sm:$0xff] }
   0x3   :  { %v387_v5 = vpack.c.bf16 %v66_v4, %v65_v2  ;;  %v391_v8 = vpack.c.bf16 %v68_v7, %v67_v6  ;;  %v47_v9 = vld [vmem:[%s591_s0] sm:$0xff]  ;;  %v69_v11 = vld [vmem:[%s590_s1 + $0x30] sm:$0xff]  ;;  %v70_v12 = vld [vmem:[%s590_s1 + $0x38] sm:$0xff] }
   0x4   :  { %384 = vmatprep.subr.bf16.mxu0 %v383_v3  ;;  %415 = vmatprep.subr.bf16.mxu1 %v383_v3  ;;  %v55_v10 = vld [vmem:[%s591_s0 + $0x40] sm:$0xff]  ;;  %v395_v13 = vpack.c.bf16 %v70_v12, %v69_v11  ;;  %v72_v15 = vld [vmem:[%s590_s1 + $0x48] sm:$0xff]  ;;  %v73_v17 = vld [vmem:[%s590_s1 + $0x50] sm:$0xff] }
   0x5   :  { %386 = vmatpush3.bf16.msra.mxu0 %v383_v3  ;;  %423 = vmatpush3.bf16.msra.mxu1 %v383_v3  ;;  %v71_v14 = vld [vmem:[%s590_s1 + $0x40] sm:$0xff]  ;;  %v74_v18 = vld [vmem:[%s590_s1 + $0x58] sm:$0xff]  ;;  %v76_v21 = vld [vmem:[%s590_s1 + $0x68] sm:$0xff] }
   0x6   :  { %388 = vmatprep.subr.bf16.mxu0 %v387_v5  ;;  %416 = vmatprep.subr.bf16.mxu1 %v387_v5  ;;  %v399_v16 = vpack.c.bf16 %v72_v15, %v71_v14  ;;  %v403_v19 = vpack.c.bf16 %v74_v18, %v73_v17  ;;  %v75_v20 = vld [vmem:[%s590_s1 + $0x60] sm:$0xff]  ;;  %v77_v23 = vld [vmem:[%s590_s1 + $0x70] sm:$0xff]  ;;  %v78_v24 = vld [vmem:[%s590_s1 + $0x78] sm:$0xff] }
   0x7   :  { %359 = vmatprep.mubr.f32.mxu0 %v47_v9  ;;  %371 = vmatprep.mubr.f32.mxu1 %v55_v10  ;;  %v407_v22 = vpack.c.bf16 %v76_v21, %v75_v20  ;;  %v411_v25 = vpack.c.bf16 %v78_v24, %v77_v23  ;;  %v48_v26 = vld [vmem:[%s591_s0 + $0x8] sm:$0xff]  ;;  %v49_v28 = vld [vmem:[%s591_s0 + $0x10] sm:$0xff]  ;;  %v50_v30 = vld [vmem:[%s591_s0 + $0x18] sm:$0xff] }
   0x8   :  { %v56_v27 = vld [vmem:[%s591_s0 + $0x48] sm:$0xff]  ;;  %v57_v29 = vld [vmem:[%s591_s0 + $0x50] sm:$0xff]  ;;  %v58_v31 = vld [vmem:[%s591_s0 + $0x58] sm:$0xff] }
   0x9   :  { %390 = vmatpush3.bf16.msra.mxu0 %v387_v5  ;;  %424 = vmatpush3.bf16.msra.mxu1 %v387_v5  ;;  %v51_v32 = vld [vmem:[%s591_s0 + $0x20] sm:$0xff]  ;;  %v52_v34 = vld [vmem:[%s591_s0 + $0x28] sm:$0xff]  ;;  %v53_v36 = vld [vmem:[%s591_s0 + $0x30] sm:$0xff] }
   0xa   :  { %392 = vmatprep.subr.bf16.mxu0 %v391_v8  ;;  %417 = vmatprep.subr.bf16.mxu1 %v391_v8  ;;  %v59_v33 = vld [vmem:[%s591_s0 + $0x60] sm:$0xff]  ;;  %v60_v35 = vld [vmem:[%s591_s0 + $0x68] sm:$0xff]  ;;  %v61_v37 = vld [vmem:[%s591_s0 + $0x70] sm:$0xff] }
   0xb   :  { %v54_v38 = vld [vmem:[%s591_s0 + $0x38] sm:$0xff] }
   0xc   :  { %v62_v39 = vld [vmem:[%s591_s0 + $0x78] sm:$0xff] }
   0xd   :  { %394 = vmatpush3.bf16.msra.mxu0 %v391_v8  ;;  %425 = vmatpush3.bf16.msra.mxu1 %v391_v8 }
   0xe   :  { %396 = vmatprep.subr.bf16.mxu0 %v395_v13  ;;  %418 = vmatprep.subr.bf16.mxu1 %v395_v13 }
  0x11   :  { %398 = vmatpush3.bf16.msra.mxu0 %v395_v13  ;;  %426 = vmatpush3.bf16.msra.mxu1 %v395_v13 }
  0x12   :  { %400 = vmatprep.subr.bf16.mxu0 %v399_v16  ;;  %419 = vmatprep.subr.bf16.mxu1 %v399_v16 }
  0x15   :  { %402 = vmatpush3.bf16.msra.mxu0 %v399_v16  ;;  %427 = vmatpush3.bf16.msra.mxu1 %v399_v16 }
  0x16   :  { %404 = vmatprep.subr.bf16.mxu0 %v403_v19  ;;  %420 = vmatprep.subr.bf16.mxu1 %v403_v19 }
  0x19   :  { %406 = vmatpush3.bf16.msra.mxu0 %v403_v19  ;;  %428 = vmatpush3.bf16.msra.mxu1 %v403_v19 }
  0x1a   :  { %408 = vmatprep.subr.bf16.mxu0 %v407_v22  ;;  %421 = vmatprep.subr.bf16.mxu1 %v407_v22 }
  0x1d   :  { %410 = vmatpush3.bf16.msra.mxu0 %v407_v22  ;;  %429 = vmatpush3.bf16.msra.mxu1 %v407_v22 }
  0x1e   :  { %412 = vmatprep.subr.bf16.mxu0 %v411_v25  ;;  %422 = vmatprep.subr.bf16.mxu1 %v411_v25 }
  0x21   :  { %414 = vmatpush3.bf16.msra.mxu0 %v411_v25  ;;  %430 = vmatpush3.bf16.msra.mxu1 %v411_v25 }
  0x24   :  { %360 = vmatmul.mubr.f32.vlgmr.msra.gmra.mrb[0].mxu0 %v48_v26  ;;  %372 = vmatmul.mubr.f32.vlgmr.msra.gmra.mrb[0].mxu1 %v56_v27 }
  0x25   :  { %362 = vmatprep.mubr.f32.mxu0 %v49_v28  ;;  %374 = vmatprep.mubr.f32.mxu1 %v57_v29 }
  0x28   :  { %363 = vmatmul.mubr.f32.gmra.mrb[2].mxu0 %v50_v30  ;;  %375 = vmatmul.mubr.f32.gmra.mrb[2].mxu1 %v58_v31 }
  0x29   :  { %365 = vmatprep.mubr.f32.mxu0 %v51_v32  ;;  %377 = vmatprep.mubr.f32.mxu1 %v59_v33 }
  0x2c   :  { %366 = vmatmul.mubr.f32.gmra.mrb[4].mxu0 %v52_v34  ;;  %378 = vmatmul.mubr.f32.gmra.mrb[4].mxu1 %v60_v35 }
  0x2d   :  { %368 = vmatprep.mubr.f32.mxu0 %v53_v36  ;;  %380 = vmatprep.mubr.f32.mxu1 %v61_v37 }
  0x30   :  { %369 = vmatmul.mubr.f32.gmra.mrb[6].mxu0 %v54_v38  ;;  %381 = vmatmul.mubr.f32.gmra.mrb[6].mxu1 %v62_v39 }
  0xf7   :  { %v361_v40 = vpop.f32.mrb[0].mxu0  ;;  %v373_v41 = vpop.f32.mrb[0].mxu1 }
  0xf8   :  { %276 = vst [vmem:[%s592_s2 + $0x8] sm:$0xff] %v361_v40  ;;  %284 = vst [vmem:[%s592_s2 + $0x48] sm:$0xff] %v373_v41  ;;  %v145_v42 = vpop.f32.mrb[1].mxu0  ;;  %v185_v43 = vpop.f32.mrb[1].mxu1 }
  0xf9   :  { %275 = vst [vmem:[%s592_s2] sm:$0xff] %v145_v42  ;;  %283 = vst [vmem:[%s592_s2 + $0x40] sm:$0xff] %v185_v43 }
  0xfb   :  { %v364_v44 = vpop.f32.mrb[2].mxu0  ;;  %v376_v45 = vpop.f32.mrb[2].mxu1 }
  0xfc   :  { %278 = vst [vmem:[%s592_s2 + $0x18] sm:$0xff] %v364_v44  ;;  %286 = vst [vmem:[%s592_s2 + $0x58] sm:$0xff] %v376_v45  ;;  %v155_v46 = vpop.f32.mrb[3].mxu0  ;;  %v195_v47 = vpop.f32.mrb[3].mxu1 }
  0xfd   :  { %277 = vst [vmem:[%s592_s2 + $0x10] sm:$0xff] %v155_v46  ;;  %285 = vst [vmem:[%s592_s2 + $0x50] sm:$0xff] %v195_v47 }
  0xff   :  { %v367_v48 = vpop.f32.mrb[4].mxu0  ;;  %v379_v49 = vpop.f32.mrb[4].mxu1 }
 0x100   :  { %280 = vst [vmem:[%s592_s2 + $0x28] sm:$0xff] %v367_v48  ;;  %288 = vst [vmem:[%s592_s2 + $0x68] sm:$0xff] %v379_v49  ;;  %v165_v50 = vpop.f32.mrb[5].mxu0  ;;  %v205_v51 = vpop.f32.mrb[5].mxu1 }
 0x101   :  { %279 = vst [vmem:[%s592_s2 + $0x20] sm:$0xff] %v165_v50  ;;  %287 = vst [vmem:[%s592_s2 + $0x60] sm:$0xff] %v205_v51 }
 0x103   :  { %v370_v52 = vpop.f32.mrb[6].mxu0  ;;  %v382_v53 = vpop.f32.mrb[6].mxu1 }
 0x104   :  { %282 = vst [vmem:[%s592_s2 + $0x38] sm:$0xff] %v370_v52  ;;  %290 = vst [vmem:[%s592_s2 + $0x78] sm:$0xff] %v382_v53  ;;  %v175_v54 = vpop.f32.mrb[7].mxu0  ;;  %v215_v55 = vpop.f32.mrb[7].mxu1 }
 0x105   :  { %281 = vst [vmem:[%s592_s2 + $0x30] sm:$0xff] %v175_v54  ;;  %289 = vst [vmem:[%s592_s2 + $0x70] sm:$0xff] %v215_v55 }

// kernel: gnn_layer.3
= control target key start
LH: loop header
LB: loop body
LE: loop exit
PB: predicated region body
PF: predicated region fallthrough
CT: control target
= control target key end

     0   :  { %s606_s1 = inlined_call_operand.vmem [shape: f32[128,128], index: 1, kind: input, shape index: {}]   ;;  %s607_s0 = inlined_call_operand.vmem [shape: f32[128,128], index: 0, kind: input, shape index: {}]   ;;  %s608_s2 = inlined_call_operand.vmem [shape: f32[128,128], index: 2, kind: output, shape index: {}]  }
   0x1   :  { %v63_v0 = vld [vmem:[%s606_s1] sm:$0xff]  ;;  %v64_v1 = vld [vmem:[%s606_s1 + $0x8] sm:$0xff]  ;;  %v65_v2 = vld [vmem:[%s606_s1 + $0x10] sm:$0xff] }
   0x2   :  { %v399_v3 = vpack.c.bf16 %v64_v1, %v63_v0  ;;  %v66_v4 = vld [vmem:[%s606_s1 + $0x18] sm:$0xff]  ;;  %v67_v6 = vld [vmem:[%s606_s1 + $0x20] sm:$0xff]  ;;  %v68_v7 = vld [vmem:[%s606_s1 + $0x28] sm:$0xff] }
   0x3   :  { %v403_v5 = vpack.c.bf16 %v66_v4, %v65_v2  ;;  %v407_v8 = vpack.c.bf16 %v68_v7, %v67_v6  ;;  %v47_v9 = vld [vmem:[%s607_s0] sm:$0xff]  ;;  %v69_v11 = vld [vmem:[%s606_s1 + $0x30] sm:$0xff]  ;;  %v70_v12 = vld [vmem:[%s606_s1 + $0x38] sm:$0xff] }
   0x4   :  { %400 = vmatprep.subr.bf16.mxu0 %v399_v3  ;;  %431 = vmatprep.subr.bf16.mxu1 %v399_v3  ;;  %v55_v10 = vld [vmem:[%s607_s0 + $0x40] sm:$0xff]  ;;  %v411_v13 = vpack.c.bf16 %v70_v12, %v69_v11  ;;  %v72_v15 = vld [vmem:[%s606_s1 + $0x48] sm:$0xff]  ;;  %v73_v17 = vld [vmem:[%s606_s1 + $0x50] sm:$0xff] }
   0x5   :  { %402 = vmatpush3.bf16.msra.mxu0 %v399_v3  ;;  %439 = vmatpush3.bf16.msra.mxu1 %v399_v3  ;;  %v71_v14 = vld [vmem:[%s606_s1 + $0x40] sm:$0xff]  ;;  %v74_v18 = vld [vmem:[%s606_s1 + $0x58] sm:$0xff]  ;;  %v76_v21 = vld [vmem:[%s606_s1 + $0x68] sm:$0xff] }
   0x6   :  { %404 = vmatprep.subr.bf16.mxu0 %v403_v5  ;;  %432 = vmatprep.subr.bf16.mxu1 %v403_v5  ;;  %v415_v16 = vpack.c.bf16 %v72_v15, %v71_v14  ;;  %v419_v19 = vpack.c.bf16 %v74_v18, %v73_v17  ;;  %v75_v20 = vld [vmem:[%s606_s1 + $0x60] sm:$0xff]  ;;  %v77_v23 = vld [vmem:[%s606_s1 + $0x70] sm:$0xff]  ;;  %v78_v24 = vld [vmem:[%s606_s1 + $0x78] sm:$0xff] }
   0x7   :  { %375 = vmatprep.mubr.f32.mxu0 %v47_v9  ;;  %387 = vmatprep.mubr.f32.mxu1 %v55_v10  ;;  %v423_v22 = vpack.c.bf16 %v76_v21, %v75_v20  ;;  %v427_v25 = vpack.c.bf16 %v78_v24, %v77_v23  ;;  %v48_v26 = vld [vmem:[%s607_s0 + $0x8] sm:$0xff]  ;;  %v49_v28 = vld [vmem:[%s607_s0 + $0x10] sm:$0xff]  ;;  %v50_v30 = vld [vmem:[%s607_s0 + $0x18] sm:$0xff] }
   0x8   :  { %v56_v27 = vld [vmem:[%s607_s0 + $0x48] sm:$0xff]  ;;  %v57_v29 = vld [vmem:[%s607_s0 + $0x50] sm:$0xff]  ;;  %v58_v31 = vld [vmem:[%s607_s0 + $0x58] sm:$0xff] }
   0x9   :  { %406 = vmatpush3.bf16.msra.mxu0 %v403_v5  ;;  %440 = vmatpush3.bf16.msra.mxu1 %v403_v5  ;;  %v51_v32 = vld [vmem:[%s607_s0 + $0x20] sm:$0xff]  ;;  %v52_v34 = vld [vmem:[%s607_s0 + $0x28] sm:$0xff]  ;;  %v53_v36 = vld [vmem:[%s607_s0 + $0x30] sm:$0xff] }
   0xa   :  { %408 = vmatprep.subr.bf16.mxu0 %v407_v8  ;;  %433 = vmatprep.subr.bf16.mxu1 %v407_v8  ;;  %v59_v33 = vld [vmem:[%s607_s0 + $0x60] sm:$0xff]  ;;  %v60_v35 = vld [vmem:[%s607_s0 + $0x68] sm:$0xff]  ;;  %v61_v37 = vld [vmem:[%s607_s0 + $0x70] sm:$0xff] }
   0xb   :  { %v54_v38 = vld [vmem:[%s607_s0 + $0x38] sm:$0xff] }
   0xc   :  { %v62_v39 = vld [vmem:[%s607_s0 + $0x78] sm:$0xff] }
   0xd   :  { %410 = vmatpush3.bf16.msra.mxu0 %v407_v8  ;;  %441 = vmatpush3.bf16.msra.mxu1 %v407_v8 }
   0xe   :  { %412 = vmatprep.subr.bf16.mxu0 %v411_v13  ;;  %434 = vmatprep.subr.bf16.mxu1 %v411_v13 }
  0x11   :  { %414 = vmatpush3.bf16.msra.mxu0 %v411_v13  ;;  %442 = vmatpush3.bf16.msra.mxu1 %v411_v13 }
  0x12   :  { %416 = vmatprep.subr.bf16.mxu0 %v415_v16  ;;  %435 = vmatprep.subr.bf16.mxu1 %v415_v16 }
  0x15   :  { %418 = vmatpush3.bf16.msra.mxu0 %v415_v16  ;;  %443 = vmatpush3.bf16.msra.mxu1 %v415_v16 }
  0x16   :  { %420 = vmatprep.subr.bf16.mxu0 %v419_v19  ;;  %436 = vmatprep.subr.bf16.mxu1 %v419_v19 }
  0x19   :  { %422 = vmatpush3.bf16.msra.mxu0 %v419_v19  ;;  %444 = vmatpush3.bf16.msra.mxu1 %v419_v19 }
  0x1a   :  { %424 = vmatprep.subr.bf16.mxu0 %v423_v22  ;;  %437 = vmatprep.subr.bf16.mxu1 %v423_v22 }
  0x1d   :  { %426 = vmatpush3.bf16.msra.mxu0 %v423_v22  ;;  %445 = vmatpush3.bf16.msra.mxu1 %v423_v22 }
  0x1e   :  { %428 = vmatprep.subr.bf16.mxu0 %v427_v25  ;;  %438 = vmatprep.subr.bf16.mxu1 %v427_v25 }
  0x21   :  { %430 = vmatpush3.bf16.msra.mxu0 %v427_v25  ;;  %446 = vmatpush3.bf16.msra.mxu1 %v427_v25 }
  0x24   :  { %376 = vmatmul.mubr.f32.vlgmr.msra.gmra.mrb[0].mxu0 %v48_v26  ;;  %388 = vmatmul.mubr.f32.vlgmr.msra.gmra.mrb[0].mxu1 %v56_v27 }
  0x25   :  { %378 = vmatprep.mubr.f32.mxu0 %v49_v28  ;;  %390 = vmatprep.mubr.f32.mxu1 %v57_v29 }
  0x28   :  { %379 = vmatmul.mubr.f32.gmra.mrb[2].mxu0 %v50_v30  ;;  %391 = vmatmul.mubr.f32.gmra.mrb[2].mxu1 %v58_v31 }
  0x29   :  { %381 = vmatprep.mubr.f32.mxu0 %v51_v32  ;;  %393 = vmatprep.mubr.f32.mxu1 %v59_v33 }
  0x2c   :  { %382 = vmatmul.mubr.f32.gmra.mrb[4].mxu0 %v52_v34  ;;  %394 = vmatmul.mubr.f32.gmra.mrb[4].mxu1 %v60_v35 }
  0x2d   :  { %384 = vmatprep.mubr.f32.mxu0 %v53_v36  ;;  %396 = vmatprep.mubr.f32.mxu1 %v61_v37 }
  0x30   :  { %385 = vmatmul.mubr.f32.gmra.mrb[6].mxu0 %v54_v38  ;;  %397 = vmatmul.mubr.f32.gmra.mrb[6].mxu1 %v62_v39 }
  0xf7   :  { %v377_v40 = vpop.f32.mrb[0].mxu0  ;;  %v389_v41 = vpop.f32.mrb[0].mxu1 }
  0xf8   :  { %v276_v42 = vmax.f32 %v377_v40, 0.0  ;;  %v284_v43 = vmax.f32 %v389_v41, 0.0  ;;  %v145_v44 = vpop.f32.mrb[1].mxu0  ;;  %v185_v45 = vpop.f32.mrb[1].mxu1 }
  0xf9   :  { %v275_v46 = vmax.f32 %v145_v44, 0.0  ;;  %v283_v47 = vmax.f32 %v185_v45, 0.0 }
  0xfa   :  { %292 = vst [vmem:[%s608_s2 + $0x8] sm:$0xff] %v276_v42  ;;  %300 = vst [vmem:[%s608_s2 + $0x48] sm:$0xff] %v284_v43 }
  0xfb   :  { %291 = vst [vmem:[%s608_s2] sm:$0xff] %v275_v46  ;;  %299 = vst [vmem:[%s608_s2 + $0x40] sm:$0xff] %v283_v47  ;;  %v380_v48 = vpop.f32.mrb[2].mxu0  ;;  %v392_v49 = vpop.f32.mrb[2].mxu1 }
  0xfc   :  { %v278_v50 = vmax.f32 %v380_v48, 0.0  ;;  %v286_v51 = vmax.f32 %v392_v49, 0.0  ;;  %v155_v52 = vpop.f32.mrb[3].mxu0  ;;  %v195_v53 = vpop.f32.mrb[3].mxu1 }
  0xfd   :  { %v277_v54 = vmax.f32 %v155_v52, 0.0  ;;  %v285_v55 = vmax.f32 %v195_v53, 0.0 }
  0xfe   :  { %294 = vst [vmem:[%s608_s2 + $0x18] sm:$0xff] %v278_v50  ;;  %302 = vst [vmem:[%s608_s2 + $0x58] sm:$0xff] %v286_v51 }
  0xff   :  { %293 = vst [vmem:[%s608_s2 + $0x10] sm:$0xff] %v277_v54  ;;  %301 = vst [vmem:[%s608_s2 + $0x50] sm:$0xff] %v285_v55  ;;  %v383_v56 = vpop.f32.mrb[4].mxu0  ;;  %v395_v57 = vpop.f32.mrb[4].mxu1 }
 0x100   :  { %v280_v58 = vmax.f32 %v383_v56, 0.0  ;;  %v288_v59 = vmax.f32 %v395_v57, 0.0  ;;  %v165_v60 = vpop.f32.mrb[5].mxu0  ;;  %v205_v61 = vpop.f32.mrb[5].mxu1 }
 0x101   :  { %v279_v62 = vmax.f32 %v165_v60, 0.0  ;;  %v287_v63 = vmax.f32 %v205_v61, 0.0 }
 0x102   :  { %296 = vst [vmem:[%s608_s2 + $0x28] sm:$0xff] %v280_v58  ;;  %304 = vst [vmem:[%s608_s2 + $0x68] sm:$0xff] %v288_v59 }
 0x103   :  { %295 = vst [vmem:[%s608_s2 + $0x20] sm:$0xff] %v279_v62  ;;  %303 = vst [vmem:[%s608_s2 + $0x60] sm:$0xff] %v287_v63  ;;  %v386_v0 = vpop.f32.mrb[6].mxu0  ;;  %v398_v1 = vpop.f32.mrb[6].mxu1 }
 0x104   :  { %v282_v2 = vmax.f32 %v386_v0, 0.0  ;;  %v290_v3 = vmax.f32 %v398_v1, 0.0  ;;  %v175_v4 = vpop.f32.mrb[7].mxu0  ;;  %v215_v5 = vpop.f32.mrb[7].mxu1 }
 0x105   :  { %v281_v6 = vmax.f32 %v175_v4, 0.0  ;;  %v289_v7 = vmax.f32 %v215_v5, 0.0 }
 0x106   :  { %298 = vst [vmem:[%s608_s2 + $0x38] sm:$0xff] %v282_v2  ;;  %306 = vst [vmem:[%s608_s2 + $0x78] sm:$0xff] %v290_v3 }
 0x107   :  { %297 = vst [vmem:[%s608_s2 + $0x30] sm:$0xff] %v281_v6  ;;  %305 = vst [vmem:[%s608_s2 + $0x70] sm:$0xff] %v289_v7 }

</bundles_post_ra>
